<compile_context>
chip_gen: v7x
topology: tpu7x:2x2x1
jax: 0.10.0
libtpu: 0.0.40
codegen_flags: <defaults>
</compile_context>

<pallas_src>
import jax
import jax.numpy as jnp
from jax.experimental import pallas as pl
from jax.experimental.pallas import tpu as pltpu

LN_EPS = 1e-5


def _round_up(x, m):
    return ((x + m - 1) // m) * m


def _cdiv(a, b):
    return (a + b - 1) // b


def ffn_kernel(x_ref, w1_ref, b1_ref, g_ref, beta_ref,
               w2_ref, b2_ref, w3_ref, b3_ref, o_ref):
    xt = x_ref[...]                                            # (in_dim, tb) f32

    # layer1: h1^T = W1 @ x^T + b1  -> (hidden, tb); N = tb fills MXU columns.
    h1 = jnp.dot(w1_ref[...], xt, preferred_element_type=jnp.float32) + b1_ref[...]

    # LayerNorm over hidden (sublane axis 0); biased variance, like torch.
    inv_h = 1.0 / float(h1.shape[0])
    mean = jnp.sum(h1, axis=0, keepdims=True) * inv_h          # (1, tb)
    diff = h1 - mean
    var = jnp.sum(diff * diff, axis=0, keepdims=True) * inv_h  # (1, tb)
    h1n = diff * jax.lax.rsqrt(var + LN_EPS) * g_ref[...] + beta_ref[...]
    a1 = jnp.maximum(h1n, 0.0)

    # layer2 + ReLU: (hidden, hidden) @ (hidden, tb)
    a2 = jnp.maximum(
        jnp.dot(w2_ref[...], a1, preferred_element_type=jnp.float32) + b2_ref[...],
        0.0)

    # layer3: (out_dim, hidden) @ (hidden, tb) -> lane-dense (out_dim, tb) store.
    o_ref[...] = (jnp.dot(w3_ref[...], a2, preferred_element_type=jnp.float32)
                  + b3_ref[...]).astype(o_ref.dtype)


def feedforward_nn(obs, params, tile_b=8192):
    """obs: (B, in_dim) float32. params: PyTorch-oriented weights (out, in),
    biases / LN params as (dim, 1) columns.

    Computes the MLP on obs^T so the batch lives on the lane axis (lane-dense
    blocks, large-N matmuls).  1-D grid over batch tiles; weights stay
    VMEM-resident via constant index_maps."""
    B, in_dim = obs.shape
    hidden = params["w1"].shape[0]
    out_dim = params["w3"].shape[0]

    # Lane-dense tile (multiple of 128), capped at ceil(B/2) so the grid has
    # >= 2 steps whenever B > 128 (keeps both v7x TensorCores busy).
    half = _round_up(_cdiv(B, 2), 128)
    tb = max(128, min(_round_up(tile_b, 128), half))
    Bp = _round_up(B, tb)

    obs_t = obs.T                                  # (in_dim, B), batch on lanes
    if Bp != B:
        obs_t = jnp.pad(obs_t, ((0, 0), (0, Bp - B)))

    grid = (Bp // tb,)

    # Grid-invariant blocks: DMA'd once, VMEM-resident for the whole grid.
    def const_spec(shape):
        return pl.BlockSpec(shape, lambda i: (0,) * len(shape))

    in_specs = [
        pl.BlockSpec((in_dim, tb), lambda i: (0, i)),   # obs^T (lane-dense)
        const_spec((hidden, in_dim)),                   # w1
        const_spec((hidden, 1)),                        # b1
        const_spec((hidden, 1)),                        # gamma
        const_spec((hidden, 1)),                        # beta
        const_spec((hidden, hidden)),                   # w2
        const_spec((hidden, 1)),                        # b2
        const_spec((out_dim, hidden)),                  # w3
        const_spec((out_dim, 1)),                       # b3
    ]
    out_specs = pl.BlockSpec((out_dim, tb), lambda i: (0, i))   # out^T (lane-dense)

    out_t = pl.pallas_call(
        ffn_kernel,
        out_shape=jax.ShapeDtypeStruct((out_dim, Bp), jnp.float32),
        grid=grid,
        in_specs=in_specs,
        out_specs=out_specs,
        compiler_params=pltpu.CompilerParams(
            dimension_semantics=("parallel",),
            vmem_limit_bytes=32 * 1024 * 1024),
    )(obs_t,
      params["w1"], params["b1"], params["gamma"], params["beta"],
      params["w2"], params["b2"], params["w3"], params["b3"])

    if Bp != B:
        out_t = out_t[:, :B]
    return out_t.T                                   # (B, out_dim)


def init_params(key, in_dim, out_dim, hidden=64):
    """Deterministic init mirroring the PyTorch module:
       weights ~ N(0, 0.1) stored as (out, in); biases ~ U(+-1/sqrt(fan_in))
       stored as (out, 1); LayerNorm gamma=1, beta=0 stored as (hidden, 1)."""
    k = jax.random.split(key, 6)

    def ub(kk, fan_in, n):
        bound = 1.0 / jnp.sqrt(fan_in)
        return jax.random.uniform(kk, (n, 1), jnp.float32, -bound, bound)

    return {
        "w1": 0.1 * jax.random.normal(k[0], (hidden, in_dim), jnp.float32),
        "b1": ub(k[1], in_dim, hidden),
        "gamma": jnp.ones((hidden, 1), jnp.float32),
        "beta": jnp.zeros((hidden, 1), jnp.float32),
        "w2": 0.1 * jax.random.normal(k[2], (hidden, hidden), jnp.float32),
        "b2": ub(k[3], hidden, hidden),
        "w3": 0.1 * jax.random.normal(k[4], (out_dim, hidden), jnp.float32),
        "b3": ub(k[5], hidden, out_dim),
    }


def reference(obs, p):
    h1 = obs @ p["w1"].T + p["b1"][:, 0]
    mean = jnp.mean(h1, axis=-1, keepdims=True)
    var = jnp.mean((h1 - mean) ** 2, axis=-1, keepdims=True)
    h1n = (h1 - mean) / jnp.sqrt(var + LN_EPS) * p["gamma"][:, 0] + p["beta"][:, 0]
    a1 = jnp.maximum(h1n, 0.0)
    a2 = jnp.maximum(a1 @ p["w2"].T + p["b2"][:, 0], 0.0)
    return a2 @ p["w3"].T + p["b3"][:, 0]


if __name__ == "__main__":
    in_dim, out_dim = 16, 4
    key = jax.random.PRNGKey(0)
    k_obs, k_par, k_obs2 = jax.random.split(key, 3)
    params = init_params(k_par, in_dim, out_dim)

    # Small single-tile case (typical PPO obs batch).
    batch = 8
    obs = jax.random.normal(k_obs, (batch, in_dim), jnp.float32)
    out = jax.block_until_ready(feedforward_nn(obs, params))
    ref = reference(obs, params)
    assert out.shape == (batch, out_dim)
    assert jnp.allclose(out, ref, atol=1e-4, rtol=1e-4), "mismatch vs JAX reference (small)"

    # Multi-tile + padding case to exercise the batch grid / double buffering.
    batch2 = 300
    obs2 = jax.random.normal(k_obs2, (batch2, in_dim), jnp.float32)
    out2 = jax.block_until_ready(feedforward_nn(obs2, params, tile_b=128))
    ref2 = reference(obs2, params)
    assert out2.shape == (batch2, out_dim)
    assert jnp.allclose(out2, ref2, atol=1e-4, rtol=1e-4), "mismatch vs JAX reference (tiled)"

    print("KERNEL_OK")
</pallas_src>

<mosaic_0001>
module attributes {stable_mosaic.version = 11 : i64} {
  func.func @ffn_kernel(%arg0: i32, %arg1: memref<16x128xf32, #tpu.memory_space<vmem>>, %arg2: memref<64x16xf32, #tpu.memory_space<vmem>>, %arg3: memref<64x1xf32, #tpu.memory_space<vmem>>, %arg4: memref<64x1xf32, #tpu.memory_space<vmem>>, %arg5: memref<64x1xf32, #tpu.memory_space<vmem>>, %arg6: memref<64x64xf32, #tpu.memory_space<vmem>>, %arg7: memref<64x1xf32, #tpu.memory_space<vmem>>, %arg8: memref<4x64xf32, #tpu.memory_space<vmem>>, %arg9: memref<4x1xf32, #tpu.memory_space<vmem>>, %arg10: memref<4x128xf32, #tpu.memory_space<vmem>>) attributes {dimension_semantics = [#tpu.dimension_semantics<parallel>], iteration_bounds = array<i64: 1>, scalar_prefetch = 0 : i64, scratch_operands = 0 : i64, tpu.core_type = #tpu.core_type<tc>, window_params = [{transform_indices = @transform_0, window_bounds = array<i64: 16, 128>}, {pipeline_mode = #tpu.pipeline_mode<synchronous>, transform_indices = @transform_1, window_bounds = array<i64: 64, 16>}, {pipeline_mode = #tpu.pipeline_mode<synchronous>, transform_indices = @transform_2, window_bounds = array<i64: 64, 1>}, {pipeline_mode = #tpu.pipeline_mode<synchronous>, transform_indices = @transform_3, window_bounds = array<i64: 64, 1>}, {pipeline_mode = #tpu.pipeline_mode<synchronous>, transform_indices = @transform_4, window_bounds = array<i64: 64, 1>}, {pipeline_mode = #tpu.pipeline_mode<synchronous>, transform_indices = @transform_5, window_bounds = array<i64: 64, 64>}, {pipeline_mode = #tpu.pipeline_mode<synchronous>, transform_indices = @transform_6, window_bounds = array<i64: 64, 1>}, {pipeline_mode = #tpu.pipeline_mode<synchronous>, transform_indices = @transform_7, window_bounds = array<i64: 4, 64>}, {pipeline_mode = #tpu.pipeline_mode<synchronous>, transform_indices = @transform_8, window_bounds = array<i64: 4, 1>}, {transform_indices = @transform_9, window_bounds = array<i64: 4, 128>}]} {
    %c0 = arith.constant 0 : index
    %c0_0 = arith.constant 0 : index
    %0 = vector.load %arg1[%c0, %c0_0] : memref<16x128xf32, #tpu.memory_space<vmem>>, vector<16x128xf32>
    %c0_1 = arith.constant 0 : index
    %c0_2 = arith.constant 0 : index
    %1 = vector.load %arg2[%c0_1, %c0_2] : memref<64x16xf32, #tpu.memory_space<vmem>>, vector<64x16xf32>
    %cst = arith.constant dense<0.000000e+00> : vector<64x128xf32>
    %2 = tpu.matmul %1, %0, %cst {dimension_numbers = #tpu.dot_dimension_numbers<[1], [0], [0], [1], [0, 0, 1, 1], [], []>} : vector<64x16xf32>, vector<16x128xf32>, vector<64x128xf32> -> vector<64x128xf32>
    %c0_3 = arith.constant 0 : index
    %c0_4 = arith.constant 0 : index
    %3 = vector.load %arg3[%c0_3, %c0_4] : memref<64x1xf32, #tpu.memory_space<vmem>>, vector<64x1xf32>
    %4 = vector.broadcast %3 : vector<64x1xf32> to vector<64x128xf32>
    %5 = arith.addf %2, %4 : vector<64x128xf32>
    %cst_5 = arith.constant dense<0.000000e+00> : vector<128xf32>
    %6 = vector.multi_reduction <add>, %5, %cst_5 [0] : vector<64x128xf32> to vector<128xf32>
    %7 = vector.shape_cast %6 : vector<128xf32> to vector<1x128xf32>
    %cst_6 = arith.constant 1.562500e-02 : f32
    %8 = vector.broadcast %cst_6 : f32 to vector<1x128xf32>
    %9 = arith.mulf %7, %8 : vector<1x128xf32>
    %10 = vector.broadcast %9 : vector<1x128xf32> to vector<64x128xf32>
    %11 = arith.subf %5, %10 : vector<64x128xf32>
    %12 = arith.mulf %11, %11 : vector<64x128xf32>
    %cst_7 = arith.constant dense<0.000000e+00> : vector<128xf32>
    %13 = vector.multi_reduction <add>, %12, %cst_7 [0] : vector<64x128xf32> to vector<128xf32>
    %14 = vector.shape_cast %13 : vector<128xf32> to vector<1x128xf32>
    %cst_8 = arith.constant 1.562500e-02 : f32
    %15 = vector.broadcast %cst_8 : f32 to vector<1x128xf32>
    %16 = arith.mulf %14, %15 : vector<1x128xf32>
    %cst_9 = arith.constant 9.99999974E-6 : f32
    %17 = vector.broadcast %cst_9 : f32 to vector<1x128xf32>
    %18 = arith.addf %16, %17 : vector<1x128xf32>
    %19 = math.rsqrt %18 : vector<1x128xf32>
    %20 = vector.broadcast %19 : vector<1x128xf32> to vector<64x128xf32>
    %21 = arith.mulf %11, %20 : vector<64x128xf32>
    %c0_10 = arith.constant 0 : index
    %c0_11 = arith.constant 0 : index
    %22 = vector.load %arg4[%c0_10, %c0_11] : memref<64x1xf32, #tpu.memory_space<vmem>>, vector<64x1xf32>
    %23 = vector.broadcast %22 : vector<64x1xf32> to vector<64x128xf32>
    %24 = arith.mulf %21, %23 : vector<64x128xf32>
    %c0_12 = arith.constant 0 : index
    %c0_13 = arith.constant 0 : index
    %25 = vector.load %arg5[%c0_12, %c0_13] : memref<64x1xf32, #tpu.memory_space<vmem>>, vector<64x1xf32>
    %26 = vector.broadcast %25 : vector<64x1xf32> to vector<64x128xf32>
    %27 = arith.addf %24, %26 : vector<64x128xf32>
    %cst_14 = arith.constant 0.000000e+00 : f32
    %28 = vector.broadcast %cst_14 : f32 to vector<64x128xf32>
    %29 = arith.maximumf %27, %28 : vector<64x128xf32>
    %c0_15 = arith.constant 0 : index
    %c0_16 = arith.constant 0 : index
    %30 = vector.load %arg6[%c0_15, %c0_16] : memref<64x64xf32, #tpu.memory_space<vmem>>, vector<64x64xf32>
    %cst_17 = arith.constant dense<0.000000e+00> : vector<64x128xf32>
    %31 = tpu.matmul %30, %29, %cst_17 {dimension_numbers = #tpu.dot_dimension_numbers<[1], [0], [0], [1], [0, 0, 1, 1], [], []>} : vector<64x64xf32>, vector<64x128xf32>, vector<64x128xf32> -> vector<64x128xf32>
    %c0_18 = arith.constant 0 : index
    %c0_19 = arith.constant 0 : index
    %32 = vector.load %arg7[%c0_18, %c0_19] : memref<64x1xf32, #tpu.memory_space<vmem>>, vector<64x1xf32>
    %33 = vector.broadcast %32 : vector<64x1xf32> to vector<64x128xf32>
    %34 = arith.addf %31, %33 : vector<64x128xf32>
    %cst_20 = arith.constant 0.000000e+00 : f32
    %35 = vector.broadcast %cst_20 : f32 to vector<64x128xf32>
    %36 = arith.maximumf %34, %35 : vector<64x128xf32>
    %c0_21 = arith.constant 0 : index
    %c0_22 = arith.constant 0 : index
    %37 = vector.load %arg8[%c0_21, %c0_22] : memref<4x64xf32, #tpu.memory_space<vmem>>, vector<4x64xf32>
    %cst_23 = arith.constant dense<0.000000e+00> : vector<4x128xf32>
    %38 = tpu.matmul %37, %36, %cst_23 {dimension_numbers = #tpu.dot_dimension_numbers<[1], [0], [0], [1], [0, 0, 1, 1], [], []>} : vector<4x64xf32>, vector<64x128xf32>, vector<4x128xf32> -> vector<4x128xf32>
    %c0_24 = arith.constant 0 : index
    %c0_25 = arith.constant 0 : index
    %39 = vector.load %arg9[%c0_24, %c0_25] : memref<4x1xf32, #tpu.memory_space<vmem>>, vector<4x1xf32>
    %40 = vector.broadcast %39 : vector<4x1xf32> to vector<4x128xf32>
    %41 = arith.addf %38, %40 : vector<4x128xf32>
    %c0_26 = arith.constant 0 : index
    %c0_27 = arith.constant 0 : index
    %42 = vector.load %arg10[%c0_26, %c0_27] : memref<4x128xf32, #tpu.memory_space<vmem>>, vector<4x128xf32>
    tpu.vector_store %arg10[%c0_26, %c0_27], %41 {strides = array<i32>} : memref<4x128xf32, #tpu.memory_space<vmem>>, vector<4x128xf32>,
    return
  }
  func.func @transform_0(%arg0: i32) -> (i32, i32) {
    %c0_i32 = arith.constant 0 : i32
    %c0_i32_0 = arith.constant 0 : i32
    return %c0_i32, %arg0 : i32, i32
  }
  func.func @transform_1(%arg0: i32) -> (i32, i32) {
    %c0_i32 = arith.constant 0 : i32
    %c0_i32_0 = arith.constant 0 : i32
    %c0_i32_1 = arith.constant 0 : i32
    return %c0_i32, %c0_i32_0 : i32, i32
  }
  func.func @transform_2(%arg0: i32) -> (i32, i32) {
    %c0_i32 = arith.constant 0 : i32
    %c0_i32_0 = arith.constant 0 : i32
    %c0_i32_1 = arith.constant 0 : i32
    return %c0_i32, %c0_i32_0 : i32, i32
  }
  func.func @transform_3(%arg0: i32) -> (i32, i32) {
    %c0_i32 = arith.constant 0 : i32
    %c0_i32_0 = arith.constant 0 : i32
    %c0_i32_1 = arith.constant 0 : i32
    return %c0_i32, %c0_i32_0 : i32, i32
  }
  func.func @transform_4(%arg0: i32) -> (i32, i32) {
    %c0_i32 = arith.constant 0 : i32
    %c0_i32_0 = arith.constant 0 : i32
    %c0_i32_1 = arith.constant 0 : i32
    return %c0_i32, %c0_i32_0 : i32, i32
  }
  func.func @transform_5(%arg0: i32) -> (i32, i32) {
    %c0_i32 = arith.constant 0 : i32
    %c0_i32_0 = arith.constant 0 : i32
    %c0_i32_1 = arith.constant 0 : i32
    return %c0_i32, %c0_i32_0 : i32, i32
  }
  func.func @transform_6(%arg0: i32) -> (i32, i32) {
    %c0_i32 = arith.constant 0 : i32
    %c0_i32_0 = arith.constant 0 : i32
    %c0_i32_1 = arith.constant 0 : i32
    return %c0_i32, %c0_i32_0 : i32, i32
  }
  func.func @transform_7(%arg0: i32) -> (i32, i32) {
    %c0_i32 = arith.constant 0 : i32
    %c0_i32_0 = arith.constant 0 : i32
    %c0_i32_1 = arith.constant 0 : i32
    return %c0_i32, %c0_i32_0 : i32, i32
  }
  func.func @transform_8(%arg0: i32) -> (i32, i32) {
    %c0_i32 = arith.constant 0 : i32
    %c0_i32_0 = arith.constant 0 : i32
    %c0_i32_1 = arith.constant 0 : i32
    return %c0_i32, %c0_i32_0 : i32, i32
  }
  func.func @transform_9(%arg0: i32) -> (i32, i32) {
    %c0_i32 = arith.constant 0 : i32
    %c0_i32_0 = arith.constant 0 : i32
    return %c0_i32, %arg0 : i32, i32
  }
}

</mosaic_0001>

<bundles_post_ra>
// kernel: tpu_custom_call.1
= control target key start
LH: loop header
LB: loop body
LE: loop exit
PB: predicated region body
PF: predicated region fallthrough
CT: control target
= control target key end

     0   :  { %vm91_vm0 = vcmask 130048   ;;  %v864_v4 = vmov 0   ;;  %s1104_s0 = inlined_call_operand.vmem [shape: f32[16,128], index: 0, kind: input, shape index: {}]   ;;  %s1105_s1 = inlined_call_operand.vmem [shape: f32[64,16], index: 1, kind: input, shape index: {}]   ;;  %s1106_s2 = inlined_call_operand.vmem [shape: f32[64,1], index: 2, kind: input, shape index: {}]   ;;  %s1107_s3 = inlined_call_operand.vmem [shape: f32[64,1], index: 3, kind: input, shape index: {}]   ;;  %s1108_s4 = inlined_call_operand.vmem [shape: f32[64,1], index: 4, kind: input, shape index: {}]   ;;  %s1109_s5 = inlined_call_operand.vmem [shape: f32[64,64], index: 5, kind: input, shape index: {}]   ;;  %s1110_s6 = inlined_call_operand.vmem [shape: f32[64,1], index: 6, kind: input, shape index: {}]   ;;  %s1111_s7 = inlined_call_operand.vmem [shape: f32[4,64], index: 7, kind: input, shape index: {}]   ;;  %s1112_s8 = inlined_call_operand.vmem [shape: f32[4,1], index: 8, kind: input, shape index: {}]   ;;  %s1113_s9 = inlined_call_operand.hbm [shape: f32[4,128], index: 9, kind: output, shape index: {}]  }
   0x1   :  { %v33_v0 = vld [vmem:[%s1104_s0] sm:$0xff]  ;;  %v34_v1 = vld [vmem:[%s1104_s0 + $0x8] sm:$0xff]  ;;  %836 = vset.pattern.permute.xlu0 %v864_v4  ;;  %837 = vset.pattern.permute.xlu1 %v864_v4  ;;  %v45_v7 = vld [vmem:[%s1106_s2 + $0x10] sm:$0xff] }
   0x2   :  { %v35_v2 = vld [vmem:[%s1105_s1] sm:$0xff]  ;;  %v799_v3 = vpack.c.bf16 %v34_v1, %v33_v0  ;;  %v36_v6 = vld [vmem:[%s1105_s1 + $0x8] sm:$0xff]  ;;  %v37_v8 = vld [vmem:[%s1105_s1 + $0x10] sm:$0xff]  ;;  %63 = vperm.xlu1 %837, %v45_v7  }
   0x3   :  { %740 = vmatprep.mubr.msk.f32.mxu0 %vm91_vm0, %v35_v2  ;;  %v43_v5 = vld [vmem:[%s1106_s2] sm:$0xff]  ;;  %v44_v9 = vld [vmem:[%s1106_s2 + $0x8] sm:$0xff]  ;;  %v46_v10 = vld [vmem:[%s1106_s2 + $0x18] sm:$0xff] }
   0x4   :  { %800 = vmatprep.subr.bf16.mxu0 %v799_v3  ;;  %53 = vperm.xlu0 %836, %v43_v5   ;;  %v38_v11 = vld [vmem:[%s1105_s1 + $0x18] sm:$0xff]  ;;  %v39_v12 = vld [vmem:[%s1105_s1 + $0x20] sm:$0xff]  ;;  %v48_v14 = vld [vmem:[%s1106_s2 + $0x28] sm:$0xff] }
   0x5   :  { %802 = vmatpush3.bf16.msra.mxu0 %v799_v3  ;;  %v47_v13 = vld [vmem:[%s1106_s2 + $0x20] sm:$0xff]  ;;  %v40_v15 = vld [vmem:[%s1105_s1 + $0x28] sm:$0xff]  ;;  %v41_v16 = vld [vmem:[%s1105_s1 + $0x30] sm:$0xff] }
   0x6   :  { %68 = vperm.xlu1 %837, %v46_v10   ;;  %v49_v17 = vld [vmem:[%s1106_s2 + $0x30] sm:$0xff]  ;;  %v50_v18 = vld [vmem:[%s1106_s2 + $0x38] sm:$0xff] }
   0x8   :  { %741 = vmatmul.mubr.msk.f32.vlgmr.msra.gmra.mrb[0].mxu0 %vm91_vm0, %v36_v6  ;;  %58 = vperm.xlu0 %836, %v44_v9  }
   0x9   :  { %743 = vmatprep.mubr.msk.f32.mxu0 %vm91_vm0, %v37_v8 }
   0xa   :  { %78 = vperm.xlu1 %837, %v48_v14  }
   0xc   :  { %744 = vmatmul.mubr.msk.f32.gmra.mrb[2].mxu0 %vm91_vm0, %v38_v11  ;;  %73 = vperm.xlu0 %836, %v47_v13  }
   0xd   :  { %746 = vmatprep.mubr.msk.f32.mxu0 %vm91_vm0, %v39_v12 }
   0xe   :  { %14 = vsyncpa [#allocation3], 0  ;;  %v42_v19 = vld [vmem:[%s1105_s1 + $0x38] sm:$0xff]  ;;  %v275_v20 = vld [vmem:[%s1107_s3] sm:$0xff]  ;;  %88 = vperm.xlu1 %837, %v50_v18   ;;  %vm451_vm1 = vcmask 523264   ;;  %vm866_vm2 = vmmov 0  }
   0xf   :  { %v276_v21 = vld [vmem:[%s1107_s3 + $0x8] sm:$0xff]  ;;  %v331_v22 = vld [vmem:[%s1108_s4] sm:$0xff]  ;;  %v277_v24 = vld [vmem:[%s1107_s3 + $0x10] sm:$0xff]  ;;  %s868_s13 = smov [#allocation2]  }
  0x10   :  { %747 = vmatmul.mubr.msk.f32.gmra.mrb[4].mxu0 %vm91_vm0, %v40_v15  ;;  %83 = vperm.xlu0 %836, %v49_v17   ;;  %v332_v23 = vld [vmem:[%s1108_s4 + $0x8] sm:$0xff]  ;;  %v278_v25 = vld [vmem:[%s1107_s3 + $0x18] sm:$0xff]  ;;  %v333_v26 = vld [vmem:[%s1108_s4 + $0x10] sm:$0xff] }
  0x11   :  { %749 = vmatprep.mubr.msk.f32.mxu0 %vm91_vm0, %v41_v16  ;;  %v334_v27 = vld [vmem:[%s1108_s4 + $0x18] sm:$0xff]  ;;  %v279_v28 = vld [vmem:[%s1107_s3 + $0x20] sm:$0xff]  ;;  %v280_v29 = vld [vmem:[%s1107_s3 + $0x28] sm:$0xff] }
  0x12   :  { %290 = vperm.xlu1 %837, %v276_v21   ;;  %v335_v30 = vld [vmem:[%s1108_s4 + $0x20] sm:$0xff]  ;;  %v336_v31 = vld [vmem:[%s1108_s4 + $0x28] sm:$0xff]  ;;  %v281_v32 = vld [vmem:[%s1107_s3 + $0x30] sm:$0xff] }
  0x13   :  { %v282_v33 = vld [vmem:[%s1107_s3 + $0x38] sm:$0xff]  ;;  %v337_v34 = vld [vmem:[%s1108_s4 + $0x30] sm:$0xff]  ;;  %v403_v36 = vld [vmem:[%s1110_s6] sm:$0xff] }
  0x14   :  { %750 = vmatmul.mubr.msk.f32.gmra.mrb[6].mxu0 %vm91_vm0, %v42_v19  ;;  %285 = vperm.xlu0 %836, %v275_v20   ;;  %v338_v35 = vld [vmem:[%s1108_s4 + $0x38] sm:$0xff]  ;;  %v404_v37 = vld [vmem:[%s1110_s6 + $0x8] sm:$0xff]  ;;  %v405_v38 = vld [vmem:[%s1110_s6 + $0x10] sm:$0xff]  ;;  %s676_s4 = sshll.u32 %s868_s13, 4  ;;  %s677_s4 = int_to_ptr.vmem [resolvable:$true] %s676_s4 }
  0x15   :  { %v406_v39 = vld [vmem:[%s1110_s6 + $0x18] sm:$0xff]  ;;  %v407_v40 = vld [vmem:[%s1110_s6 + $0x20] sm:$0xff]  ;;  %v408_v41 = vld [vmem:[%s1110_s6 + $0x28] sm:$0xff]  ;;  %s840_s14 = scalar_lea.vmem %s677_s4, 64  ;;  %p845_p1 = scmp.lt.s32.totalorder %s677_s4, %s677_s4 }
  0x16   :  { %346 = vperm.xlu1 %837, %v332_v23   ;;  %v409_v42 = vld [vmem:[%s1110_s6 + $0x30] sm:$0xff]  ;;  %v410_v43 = vld [vmem:[%s1110_s6 + $0x38] sm:$0xff]  ;;  %v590_v44 = vld [vmem:[%s1112_s8] sm:$0xf]  ;;  %p841_p0 = scmp.ne.s32.totalorder %s677_s4, %s840_s14  ;;  %p846_p2 = scmp.lt.s32.totalorder %s840_s14, %s840_s14 }
  0x17   :  { %v395_v45 = vld [vmem:[%s1109_s5] sm:$0xff] }
  0x18   :  { %341 = vperm.xlu0 %836, %v331_v22   ;;  %768 = vmatprep.mubr.msk.f32.mxu1 %vm451_vm1, %v395_v45  ;;  %p847_p3 = por %p846_p2, %p845_p1 }
  0x1a   :  { %300 = vperm.xlu1 %837, %v278_v25   ;;  %p848_p4 = pnand %p847_p3, %p841_p0 }
  0x1c   :  { %295 = vperm.xlu0 %836, %v277_v24  }
  0x1e   :  { %356 = vperm.xlu1 %837, %v334_v27  }
  0x20   :  { %351 = vperm.xlu0 %836, %v333_v26  }
  0x22   :  { %310 = vperm.xlu1 %837, %v280_v29  }
  0x24   :  { %305 = vperm.xlu0 %836, %v279_v28  }
  0x26   :  { %366 = vperm.xlu1 %837, %v336_v31  }
  0x28   :  { %361 = vperm.xlu0 %836, %v335_v30  }
  0x2a   :  { %320 = vperm.xlu1 %837, %v282_v33  }
  0x2c   :  { %315 = vperm.xlu0 %836, %v281_v32  }
  0x2e   :  { %376 = vperm.xlu1 %837, %v338_v35  }
  0x30   :  { %371 = vperm.xlu0 %836, %v337_v34  }
  0x32   :  { %418 = vperm.xlu1 %837, %v404_v37  }
  0x34   :  { %413 = vperm.xlu0 %836, %v403_v36  }
  0x36   :  { %428 = vperm.xlu1 %837, %v406_v39  }
  0x38   :  { %423 = vperm.xlu0 %836, %v405_v38  }
  0x3a   :  { %438 = vperm.xlu1 %837, %v408_v41  }
  0x3c   :  { %433 = vperm.xlu0 %836, %v407_v40  }
  0x3e   :  { %448 = vperm.xlu1 %837, %v410_v43  }
  0x40   :  { %443 = vperm.xlu0 %836, %v409_v42  }
  0x44   :  { %593 = vperm.xlu0 %836, %v590_v44  }
  0x81   :  { %v64_v47 = vpop.permute.xlu1 %63 }
  0x83   :  { %v54_v46 = vpop.permute.xlu0 %53 }
  0x85   :  { %v69_v53 = vpop.permute.xlu1 %68 }
  0x87   :  { %v59_v48 = vpop.permute.xlu0 %58 }
  0x89   :  { %v79_v62 = vpop.permute.xlu1 %78 }
  0x8b   :  { %v74_v58 = vpop.permute.xlu0 %73 }
  0x8d   :  { %v89_v9 = vpop.permute.xlu1 %88 }
  0x8f   :  { %v84_v5 = vpop.permute.xlu0 %83 }
  0x91   :  { %v291_v35 = vpop.permute.xlu1 %290 }
  0x93   :  { %v286_v32 = vpop.permute.xlu0 %285 }
  0x95   :  { %v347_v43 = vpop.permute.xlu1 %346 }
  0x97   :  { %v342_v40 = vpop.permute.xlu0 %341 }
  0xdb   :  { %v742_v49 = vpop.f32.mrb[0].mxu0 }
  0xdc   :  { %v188_v50 = vadd.f32 %v742_v49, %v59_v48  ;;  %v182_v51 = vpop.f32.mrb[1].mxu0  ;;  %v301_v49 = vpop.permute.xlu1 %300 }
  0xdd   :  { %v183_v52 = vadd.f32 %v182_v51, %v54_v46 }
  0xdf   :  { %v221_v54 = vadd.f32 %v188_v50, %v183_v52  ;;  %v745_v55 = vpop.f32.mrb[2].mxu0 }
  0xe0   :  { %v192_v56 = vpop.f32.mrb[3].mxu0  ;;  %v198_v59 = vadd.f32 %v745_v55, %v69_v53 }
  0xe1   :  { %v193_v57 = vadd.f32 %v192_v56, %v64_v47  ;;  %v296_v47 = vpop.permute.xlu0 %295 }
  0xe3   :  { %v222_v60 = vadd.f32 %v221_v54, %v193_v57  ;;  %v748_v61 = vpop.f32.mrb[4].mxu0  ;;  %v357_v54 = vpop.permute.xlu1 %356 }
  0xe4   :  { %v202_v63 = vpop.f32.mrb[5].mxu0  ;;  %v208_v2 = vadd.f32 %v748_v61, %v79_v62 }
  0xe5   :  { %v203_v0 = vadd.f32 %v202_v63, %v74_v58  ;;  %v223_v1 = vadd.f32 %v222_v60, %v198_v59 }
  0xe7   :  { %v224_v3 = vadd.f32 %v223_v1, %v203_v0  ;;  %v751_v4 = vpop.f32.mrb[6].mxu0 }
  0xe8   :  { %v212_v6 = vpop.f32.mrb[7].mxu0  ;;  %v218_v10 = vadd.f32 %v751_v4, %v89_v9 }
  0xe9   :  { %v213_v7 = vadd.f32 %v212_v6, %v84_v5  ;;  %v225_v8 = vadd.f32 %v224_v3, %v208_v2 }
  0xeb   :  { %v226_v11 = vadd.f32 %v225_v8, %v213_v7 }
  0xed   :  { %v227_v12 = vadd.f32 %v226_v11, %v218_v10 }
  0xef   :  { %v228_v13 = vrot.slane %v227_v12, 4 }
  0xf1   :  { %v229_v14 = vadd.f32 %v228_v13, %v227_v12 }
  0xf3   :  { %v230_v15 = vrot.slane %v229_v14, 2 }
  0xf5   :  { %v231_v16 = vadd.f32 %v230_v15, %v229_v14 }
  0xf7   :  { %v232_v17 = vrot.slane %v231_v16, 1 }
  0xf9   :  { %v233_v18 = vadd.f32 %v232_v17, %v231_v16 }
  0xfb   :  { %v234_v19 = vmul.f32 0.015625, %v233_v18 }
  0xfd   :  { %v235_v20 = vsub.f32 %v183_v52, %v234_v19  ;;  %v236_v21 = vsub.f32 %v188_v50, %v234_v19  ;;  %v237_v22 = vsub.f32 %v193_v57, %v234_v19  ;;  %v238_v23 = vsub.f32 %v198_v59, %v234_v19  ;;  %v352_v52 = vpop.permute.xlu0 %351  ;;  %v311_v59 = vpop.permute.xlu1 %310 }
  0xfe   :  { %v239_v24 = vsub.f32 %v203_v0, %v234_v19  ;;  %v240_v25 = vsub.f32 %v208_v2, %v234_v19  ;;  %v241_v26 = vsub.f32 %v213_v7, %v234_v19  ;;  %v242_v27 = vsub.f32 %v218_v10, %v234_v19 }
  0xff   :  { %v243_v28 = vmul.f32 %v235_v20, %v235_v20  ;;  %v244_v29 = vmul.f32 %v236_v21, %v236_v21  ;;  %v245_v30 = vmul.f32 %v237_v22, %v237_v22  ;;  %v246_v33 = vmul.f32 %v238_v23, %v238_v23 }
 0x100   :  { %v247_v36 = vmul.f32 %v239_v24, %v239_v24  ;;  %v248_v38 = vmul.f32 %v240_v25, %v240_v25  ;;  %v249_v41 = vmul.f32 %v241_v26, %v241_v26  ;;  %v250_v44 = vmul.f32 %v242_v27, %v242_v27 }
 0x101   :  { %v251_v31 = vadd.f32 %v244_v29, %v243_v28  ;;  %v306_v57 = vpop.permute.xlu0 %305  ;;  %v367_v62 = vpop.permute.xlu1 %366 }
 0x103   :  { %v252_v34 = vadd.f32 %v251_v31, %v245_v30 }
 0x105   :  { %v253_v37 = vadd.f32 %v252_v34, %v246_v33  ;;  %v362_v61 = vpop.permute.xlu0 %361  ;;  %v321_v0 = vpop.permute.xlu1 %320 }
 0x107   :  { %v254_v39 = vadd.f32 %v253_v37, %v247_v36 }
 0x109   :  { %v255_v42 = vadd.f32 %v254_v39, %v248_v38  ;;  %v316_v63 = vpop.permute.xlu0 %315  ;;  %v377_v19 = vpop.permute.xlu1 %376 }
 0x10b   :  { %v256_v45 = vadd.f32 %v255_v42, %v249_v41  ;;  %v397_v41 = vld [vmem:[%s1109_s5 + $0x10] sm:$0xff]  ;;  %v398_v42 = vld [vmem:[%s1109_s5 + $0x18] sm:$0xff] }
 0x10d   :  { %v257_v46 = vadd.f32 %v256_v45, %v250_v44  ;;  %v372_v14 = vpop.permute.xlu0 %371  ;;  %v400_v44 = vld [vmem:[%s1109_s5 + $0x28] sm:$0xff]  ;;  %v401_v45 = vld [vmem:[%s1109_s5 + $0x30] sm:$0xff] }
 0x10f   :  { %v258_v48 = vrot.slane %v257_v46, 4 }
 0x111   :  { %v259_v50 = vadd.f32 %v258_v48, %v257_v46  ;;  %v402_v46 = vld [vmem:[%s1109_s5 + $0x38] sm:$0xff]  ;;  %v867_v48 = vmov 0.0  }
 0x112   :  { %796 = vmatprep.mubr.msk.f32.mxu0 %vm866_vm2, %v867_v48 }
 0x113   :  { %v260_v51 = vrot.slane %v259_v50, 2 }
 0x115   :  { %v261_v53 = vadd.f32 %v260_v51, %v259_v50  ;;  %v414_v50 = vpop.permute.xlu0 %413 }
 0x117   :  { %v262_v55 = vrot.slane %v261_v53, 1 }
 0x119   :  { %v263_v56 = vadd.f32 %v262_v55, %v261_v53  ;;  %v424_v53 = vpop.permute.xlu0 %423 }
 0x11b   :  { %v264_v58 = vmul.f32 0.015625, %v263_v56 }
 0x11d   :  { %v265_v60 = vadd.f32 1e-05, %v264_v58 }
 0x11f   :  { %838 = vrsqrt.f32 %v265_v60 }
 0x129   :  { %v839_v1 = vpop.eup %838 }
 0x12a   :  { %v273_v2 = vmul.f32 %v839_v1, %v241_v26  ;;  %v267_v3 = vmul.f32 %v839_v1, %v235_v20  ;;  %v268_v4 = vmul.f32 %v839_v1, %v236_v21  ;;  %v269_v5 = vmul.f32 %v839_v1, %v237_v22 }
 0x12b   :  { %v270_v6 = vmul.f32 %v839_v1, %v238_v23  ;;  %v271_v7 = vmul.f32 %v839_v1, %v239_v24  ;;  %v272_v8 = vmul.f32 %v839_v1, %v240_v25  ;;  %v274_v9 = vmul.f32 %v839_v1, %v242_v27  ;;  %v434_v1 = vpop.permute.xlu0 %433 }
 0x12c   :  { %v329_v10 = vmul.f32 %v316_v63, %v273_v2  ;;  %v323_v11 = vmul.f32 %v286_v32, %v267_v3  ;;  %v324_v12 = vmul.f32 %v291_v35, %v268_v4  ;;  %v325_v13 = vmul.f32 %v296_v47, %v269_v5 }
 0x12d   :  { %v326_v15 = vmul.f32 %v301_v49, %v270_v6  ;;  %v327_v16 = vmul.f32 %v306_v57, %v271_v7  ;;  %v328_v17 = vmul.f32 %v311_v59, %v272_v8  ;;  %v330_v18 = vmul.f32 %v321_v0, %v274_v9  ;;  %v419_v49 = vpop.permute.xlu1 %418 }
 0x12e   :  { %v379_v28 = vadd.f32 %v342_v40, %v323_v11  ;;  %v380_v29 = vadd.f32 %v347_v43, %v324_v12  ;;  %v381_v26 = vadd.f32 %v352_v52, %v325_v13  ;;  %v385_v20 = vadd.f32 %v372_v14, %v329_v10  ;;  %v396_v40 = vld [vmem:[%s1109_s5 + $0x8] sm:$0xff]  ;;  %v399_v43 = vld [vmem:[%s1109_s5 + $0x20] sm:$0xff] }
 0x12f   :  { %v382_v21 = vadd.f32 %v357_v54, %v326_v15  ;;  %v383_v22 = vadd.f32 %v362_v61, %v327_v16  ;;  %v384_v23 = vadd.f32 %v367_v62, %v328_v17  ;;  %v386_v24 = vadd.f32 %v377_v19, %v330_v18  ;;  %v444_v13 = vpop.permute.xlu0 %443 }
 0x130   :  { %v387_v25 = vmax.f32 %v379_v28, 0.0  ;;  %v388_v27 = vmax.f32 %v380_v29, 0.0  ;;  %v389_v30 = vmax.f32 %v381_v26, 0.0  ;;  %v393_v31 = vmax.f32 %v385_v20, 0.0  ;;  %v589_v29 = vld [vmem:[%s1111_s7] sm:$0xf] }
 0x131   :  { %v390_v32 = vmax.f32 %v382_v21, 0.0  ;;  %v391_v33 = vmax.f32 %v383_v22, 0.0  ;;  %v392_v34 = vmax.f32 %v384_v23, 0.0  ;;  %v394_v35 = vmax.f32 %v386_v24, 0.0  ;;  %v429_v51 = vpop.permute.xlu1 %428 }
 0x132   :  { %v803_v36 = vpack.c.bf16 %v388_v27, %v387_v25  ;;  %v865_v47 = vmov 0.0|0.0  }
 0x133   :  { %v807_v37 = vpack.c.bf16 %v390_v32, %v389_v30  ;;  %v811_v38 = vpack.c.bf16 %v392_v34, %v391_v33  ;;  %v815_v39 = vpack.c.bf16 %v394_v35, %v393_v31  ;;  %819 = vmatprep.subr.bf16.mxu0 %v865_v47  ;;  %v594_v26 = vpop.permute.xlu0 %593 }
 0x134   :  { %804 = vmatprep.subr.bf16.mxu1 %v803_v36 }
 0x135   :  { %806 = vmatpush3.bf16.msra.mxu1 %v803_v36  ;;  %v439_v62 = vpop.permute.xlu1 %438 }
 0x136   :  { %808 = vmatprep.subr.bf16.mxu1 %v807_v37 }
 0x139   :  { %810 = vmatpush3.bf16.msra.mxu1 %v807_v37  ;;  %v449_v10 = vpop.permute.xlu1 %448 }
 0x13a   :  { %812 = vmatprep.subr.bf16.mxu1 %v811_v38 }
 0x13d   :  { %814 = vmatpush3.bf16.msra.mxu1 %v811_v38 }
 0x13e   :  { %816 = vmatprep.subr.bf16.mxu1 %v815_v39 }
 0x141   :  { %818 = vmatpush3.bf16.msra.mxu1 %v815_v39 }
 0x144   :  { %769 = vmatmul.mubr.msk.f32.vlgmr.msra.gmra.mrb[0].mxu1 %vm451_vm1, %v396_v40 }
 0x145   :  { %771 = vmatprep.mubr.msk.f32.mxu1 %vm451_vm1, %v397_v41 }
 0x148   :  { %772 = vmatmul.mubr.msk.f32.gmra.mrb[2].mxu1 %vm451_vm1, %v398_v42 }
 0x149   :  { %774 = vmatprep.mubr.msk.f32.mxu1 %vm451_vm1, %v399_v43 }
 0x14c   :  { %775 = vmatmul.mubr.msk.f32.gmra.mrb[4].mxu1 %vm451_vm1, %v400_v44 }
 0x14d   :  { %777 = vmatprep.mubr.msk.f32.mxu1 %vm451_vm1, %v401_v45 }
 0x150   :  { %778 = vmatmul.mubr.msk.f32.gmra.mrb[6].mxu1 %vm451_vm1, %v402_v46 }
 0x217   :  { %v770_v52 = vpop.f32.mrb[0].mxu1 }
 0x218   :  { %v548_v54 = vadd.f32 %v770_v52, %v419_v49  ;;  %v542_v55 = vpop.f32.mrb[1].mxu1 }
 0x219   :  { %v543_v56 = vadd.f32 %v542_v55, %v414_v50 }
 0x21a   :  { %v582_v57 = vmax.f32 %v548_v54, 0.0 }
 0x21b   :  { %v581_v58 = vmax.f32 %v543_v56, 0.0  ;;  %v773_v59 = vpop.f32.mrb[2].mxu1 }
 0x21c   :  { %v558_v60 = vadd.f32 %v773_v59, %v429_v51  ;;  %v552_v61 = vpop.f32.mrb[3].mxu1 }
 0x21d   :  { %v820_v63 = vpack.c.bf16 %v582_v57, %v581_v58  ;;  %v553_v0 = vadd.f32 %v552_v61, %v424_v53 }
 0x21e   :  { %v584_v2 = vmax.f32 %v558_v60, 0.0 }
 0x21f   :  { %v583_v3 = vmax.f32 %v553_v0, 0.0  ;;  %v776_v4 = vpop.f32.mrb[4].mxu1  ;;  %821 = vmatpush3.bf16.msra.mxu0 %v820_v63 }
 0x220   :  { %v568_v5 = vadd.f32 %v776_v4, %v439_v62  ;;  %v562_v6 = vpop.f32.mrb[5].mxu1  ;;  %822 = vmatprep.subr.bf16.mxu0 %v865_v47 }
 0x221   :  { %v823_v7 = vpack.c.bf16 %v584_v2, %v583_v3  ;;  %v563_v8 = vadd.f32 %v562_v6, %v434_v1 }
 0x222   :  { %v586_v9 = vmax.f32 %v568_v5, 0.0 }
 0x223   :  { %v585_v11 = vmax.f32 %v563_v8, 0.0  ;;  %v779_v12 = vpop.f32.mrb[6].mxu1  ;;  %824 = vmatpush3.bf16.msra.mxu0 %v823_v7 }
 0x224   :  { %v578_v14 = vadd.f32 %v779_v12, %v449_v10  ;;  %v572_v15 = vpop.f32.mrb[7].mxu1  ;;  %825 = vmatprep.subr.bf16.mxu0 %v865_v47 }
 0x225   :  { %v826_v16 = vpack.c.bf16 %v586_v9, %v585_v11  ;;  %v573_v17 = vadd.f32 %v572_v15, %v444_v13 }
 0x226   :  { %v588_v18 = vmax.f32 %v578_v14, 0.0 }
 0x227   :  { %v587_v19 = vmax.f32 %v573_v17, 0.0  ;;  %827 = vmatpush3.bf16.msra.mxu0 %v826_v16 }
 0x228   :  { %828 = vmatprep.subr.bf16.mxu0 %v865_v47 }
 0x229   :  { %v829_v28 = vpack.c.bf16 %v588_v18, %v587_v19 }
 0x22b   :  { %830 = vmatpush3.bf16.msra.mxu0 %v829_v28 }
 0x22e   :  { %797 = vmatmul.mubr.msk.f32.vlgmr.msra.gmra.mrb[8].mxu0 %vm451_vm1, %v589_v29 }
 0x301   :  { %v665_v20 = vpop.f32.mrb[8].mxu0 }
 0x302   :  { %v666_v21 = vadd.f32 %v665_v20, %v594_v26  ;;  %v798_v22 = vpop.f32.mrb[9].mxu0 }
 0x304   :  { %669 = vst [vmem:[#allocation2] sm:$0xf] %v666_v21 }
 0x305   :  { %851 = shalt.err (!%p848_p4)
}
 0x306   :  { %s852_s7 = scalar_lea.hbm %s1113_s9, 64 }
 0x307   :  { %p853_p5 = scmp.ne.s32.totalorder %s1113_s9, %s852_s7  ;;  %p856_p6 = scmp.lt.u32.totalorder %s852_s7, %s1113_s9 }
 0x309   :  { %p858_p7 = pnand %p856_p6, %p853_p5 }
 0x30b   :  { %861 = shalt.err (!%p858_p7)
}
 0x30c   :  { %679 = dma.vmem_to_hbm [thread:$0]  %s677_s4, 64, %s1113_s9, [#allocation3]  }
 0x30d   :  { %862 = dma.done.wait [#allocation3], 64  }
 0x30e   :  { %863 = vsyncadd [#allocation3], 4294967232 }
 0x30f   :  { %683 = vsyncpa [#allocation3], 1 }

</bundles_post_ra>
